<compile_context>
chip_gen: v6e
topology: v6e:2x2x1
jax: 0.10.0
libtpu: 0.0.40
codegen_flags: <defaults>
</compile_context>

<pallas_src>
import jax
import jax.numpy as jnp
from jax.experimental import pallas as pl
from jax.experimental.pallas import tpu as pltpu


# ogbn-mag style hetero schema (with reverse edges so every ntype has in-edges)
NTYPES = ["author", "field_of_study", "institution", "paper"]
CANONICAL_RELS = [
    ("author", "affiliated_with", "institution"),
    ("institution", "rev_affiliated_with", "author"),
    ("author", "writes", "paper"),
    ("paper", "rev_writes", "author"),
    ("paper", "cites", "paper"),
    ("paper", "has_topic", "field_of_study"),
    ("field_of_study", "rev_has_topic", "paper"),
]
REL_NAMES = [r for (_, r, _) in CANONICAL_RELS]

LANE = 128                       # lane width; feature dims padded to this
TD_MAX = 256                     # cap on dst-row tile (VMEM / MXU friendly)
VMEM_LIMIT = 48 * 1024 * 1024    # safe on v5e/v6e (128 MiB) and v7x (64 MiB)


def _round_up(x, m):
    return (x + m - 1) // m * m


# --------------------------- phase 1: XW_r ----------------------------------

def _xw_kernel(src_t_ref, x_ref, w_ref, xw_ref):
    """XW_r = X_{src(r)} @ W_r, computed once per relation.

    x_ref  : (N_PAD, F_IN_PAD)     bf16 features of relation r's src ntype
    w_ref  : (F_IN_PAD, F_OUT_PAD) bf16 relation weight
    xw_ref : (N_PAD, F_OUT_PAD)    bf16 output (lane-dense)
    """
    del src_t_ref  # only used by the index_maps
    xw_ref[...] = jnp.dot(
        x_ref[...], w_ref[...], preferred_element_type=jnp.float32
    ).astype(xw_ref.dtype)


def _compute_xw(src_t, x_all, w_all, *, n_pad, f_in_pad, f_out_pad, num_rels):
    return pl.pallas_call(
        _xw_kernel,
        out_shape=jax.ShapeDtypeStruct((num_rels * n_pad, f_out_pad),
                                       jnp.bfloat16),
        grid_spec=pltpu.PrefetchScalarGridSpec(
            num_scalar_prefetch=1,
            grid=(num_rels,),
            in_specs=[
                # src-type feature block picked via scalar-prefetched src id
                pl.BlockSpec((n_pad, f_in_pad),
                             lambda r, src_t: (src_t[r], 0)),
                pl.BlockSpec((f_in_pad, f_out_pad),
                             lambda r, src_t: (r, 0)),
            ],
            out_specs=pl.BlockSpec((n_pad, f_out_pad),
                                   lambda r, src_t: (r, 0)),
        ),
        compiler_params=pltpu.CompilerParams(
            dimension_semantics=("parallel",),
            vmem_limit_bytes=VMEM_LIMIT),
    )(src_t, x_all, w_all)


# --------------------- phase 2: normalize + aggregate ------------------------

def _agg_kernel(dst_t_ref, first_ref, a_ref, xw_ref, b_ref, o_ref):
    """Grid = (dst-row tile [parallel], relation [arbitrary, sorted by dst]).

    a_ref  : (TD, N_PAD)        bf16 raw 0/1 adjacency rows of relation r
    xw_ref : (N_PAD, F_OUT_PAD) bf16 precomputed X_{src(r)} @ W_r
    b_ref  : (1, F_OUT_PAD)     f32 shared bias
    o_ref  : (TD, F_OUT_PAD)    f32 output rows of relation r's dst ntype;
                                resident across the contiguous run of relations
                                sharing this dst ntype -> accumulate in place.
    """
    del dst_t_ref  # only used by the index_maps
    r = pl.program_id(1)

    a = a_ref[...]
    # GraphConv(norm='right'): divide by in-degree clamped to 1, computed
    # in-kernel from the raw 0/1 adjacency (exact in bf16).  Row-reduce goes
    # to the XLU, approx reciprocal to the EUP -> both off the VALU/MXU path.
    deg = jnp.sum(a.astype(jnp.float32), axis=-1, keepdims=True)
    inv_deg = pl.reciprocal(jnp.maximum(deg, 1.0), approx=True)
    msg = jnp.dot(a, xw_ref[...], preferred_element_type=jnp.float32) * inv_deg

    @pl.when(first_ref[r] == 1)          # first relation of this dst group:
    def _start_group():                  # initialize with msg + bias (fused)
        o_ref[...] = msg + b_ref[...]

    @pl.when(first_ref[r] == 0)          # later relations: accumulate in place
    def _accumulate():
        o_ref[...] = o_ref[...] + msg


def _aggregate(dst_t, first, a_all, xw_all, bias_pad, *,
               td, n_pad, f_out_pad, num_rels, num_ntypes):
    n_tiles = n_pad // td
    return pl.pallas_call(
        _agg_kernel,
        out_shape=jax.ShapeDtypeStruct((num_ntypes * n_pad, f_out_pad),
                                       jnp.float32),
        grid_spec=pltpu.PrefetchScalarGridSpec(
            num_scalar_prefetch=2,
            grid=(n_tiles, num_rels),
            in_specs=[
                pl.BlockSpec(
                    (td, n_pad),
                    lambda d, r, dst_t, first: (r * n_tiles + d, 0)),
                pl.BlockSpec(
                    (n_pad, f_out_pad),
                    lambda d, r, dst_t, first: (r, 0)),
                pl.BlockSpec(
                    (1, f_out_pad),
                    lambda d, r, dst_t, first: (0, 0)),
            ],
            out_specs=pl.BlockSpec(
                (td, f_out_pad),
                lambda d, r, dst_t, first: (dst_t[r] * n_tiles + d, 0)),
        ),
        compiler_params=pltpu.CompilerParams(
            dimension_semantics=("parallel", "arbitrary"),
            vmem_limit_bytes=VMEM_LIMIT),
    )(dst_t, first, a_all, xw_all, bias_pad)


# ------------------------------ layer wrapper --------------------------------

def rel_graph_conv_layer(features, adjs, weights, bias):
    """features: {ntype: [n_t, f_in]}, adjs: {rel_idx: [n_dst, n_src]} raw 0/1,
    weights: [num_rels, f_in, f_out], bias: [f_out].  Returns dict per ntype."""
    num_rels = len(CANONICAL_RELS)
    num_ntypes = len(NTYPES)
    f_in = next(iter(features.values())).shape[1]
    f_out = weights.shape[-1]

    f_in_pad = _round_up(f_in, LANE)       # lane-dense contraction dim
    f_out_pad = _round_up(f_out, LANE)     # lane-dense output dim

    max_nodes = max(f.shape[0] for f in features.values())
    # Adaptive dst-row tile: multiple of 8 (sublane), capped so VMEM blocks
    # stay small; small demos use a single tile, big graphs still get a
    # parallel (megacore-shardable) dst axis.
    td = min(TD_MAX, _round_up(max_nodes, 8))
    n_pad = _round_up(max_nodes, td)
    n_tiles = n_pad // td

    # Relations sorted by dst ntype -> each output block is one contiguous run
    # over the innermost (relation) grid axis, so direct o_ref accumulation is
    # safe (no block revisiting).
    order = sorted(range(num_rels),
                   key=lambda i: NTYPES.index(CANONICAL_RELS[i][2]))
    src_ids = [NTYPES.index(CANONICAL_RELS[i][0]) for i in order]
    dst_ids = [NTYPES.index(CANONICAL_RELS[i][2]) for i in order]
    # Every ntype must receive at least one relation (true for this schema,
    # matches HeteroGraphConv output keys).
    assert set(dst_ids) == set(range(num_ntypes))
    first = [int(j == 0 or dst_ids[j] != dst_ids[j - 1])
             for j in range(num_rels)]

    src_t = jnp.asarray(src_ids, jnp.int32)
    dst_t = jnp.asarray(dst_ids, jnp.int32)
    first = jnp.asarray(first, jnp.int32)

    # Features staged ONCE per node type (bf16, zero padded, lane-dense).
    x_all = jnp.zeros((num_ntypes * n_pad, f_in_pad), jnp.bfloat16)
    for t, nt in enumerate(NTYPES):
        x = features[nt].astype(jnp.bfloat16)
        x_all = x_all.at[t * n_pad:t * n_pad + x.shape[0], :f_in].set(x)

    # Per-relation weights and RAW 0/1 adjacency, in sorted relation order.
    w_all = jnp.zeros((num_rels * f_in_pad, f_out_pad), jnp.bfloat16)
    a_all = jnp.zeros((num_rels * n_pad, n_pad), jnp.bfloat16)
    for j, i in enumerate(order):
        w_all = w_all.at[j * f_in_pad:j * f_in_pad + f_in, :f_out].set(
            weights[i].astype(jnp.bfloat16))
        a = adjs[i].astype(jnp.bfloat16)   # 0/1 entries are exact in bf16
        a_all = a_all.at[j * n_pad:j * n_pad + a.shape[0],
                         :a.shape[1]].set(a)

    bias_pad = jnp.zeros((1, f_out_pad), jnp.float32)
    bias_pad = bias_pad.at[0, :f_out].set(bias.astype(jnp.float32))

    # Phase 1: per-relation XW (computed once per relation, reused by all dst
    # tiles in phase 2).
    xw_all = _compute_xw(src_t, x_all, w_all, n_pad=n_pad, f_in_pad=f_in_pad,
                         f_out_pad=f_out_pad, num_rels=num_rels)
    # Phase 2: normalized aggregation + bias, accumulated in lane-dense o_ref.
    out_all = _aggregate(dst_t, first, a_all, xw_all, bias_pad,
                         td=td, n_pad=n_pad, f_out_pad=f_out_pad,
                         num_rels=num_rels, num_ntypes=num_ntypes)
    del n_tiles

    return {nt: out_all[t * n_pad:t * n_pad + features[nt].shape[0], :f_out]
            for t, nt in enumerate(NTYPES)}


# ------------------------------ reference ------------------------------------

def right_norm_adj(adj):
    deg = jnp.clip(jnp.sum(adj, axis=1, keepdims=True), 1.0, None)
    return adj / deg


def rel_graph_conv_layer_ref(features, adjs, weights, bias):
    """Pure-JAX f32 reference."""
    out = {n: jnp.zeros((features[n].shape[0], weights.shape[-1]), jnp.float32)
           for n in NTYPES}
    for i, (src, _, dst) in enumerate(CANONICAL_RELS):
        a = right_norm_adj(adjs[i])
        out[dst] = out[dst] + a @ (features[src] @ weights[i])
    return {n: out[n] + bias[None, :] for n in NTYPES}


def xavier_uniform(key, shape, gain):
    fan_in, fan_out = shape[-2], shape[-1]
    a = gain * jnp.sqrt(6.0 / (fan_in + fan_out))
    return jax.random.uniform(key, shape, jnp.float32, minval=-a, maxval=a)


# --------------------------------- demo ---------------------------------------

if __name__ == "__main__":
    key = jax.random.PRNGKey(0)
    in_feats, out_feats = 32, 32
    num_rels = len(REL_NAMES)
    num_bases = 4  # < num_rels -> weight-basis path

    n_nodes = {"author": 16, "field_of_study": 8, "institution": 8, "paper": 24}

    keys = jax.random.split(key, 4 + num_rels + len(NTYPES))
    k_basis, k_coef, k_bias, _ = keys[:4]
    k_adj = keys[4:4 + num_rels]
    k_feat = keys[4 + num_rels:]

    # Parameters (deterministic init, mirrors module __init__ shapes).
    gain = jnp.sqrt(2.0)  # calculate_gain('relu')
    basis = xavier_uniform(k_basis, (num_bases, in_feats, out_feats), gain)
    coeff = xavier_uniform(k_coef, (num_rels, num_bases), 1.0)
    weights = jnp.einsum("rb,bio->rio", coeff, basis)       # WeightBasis()
    bias = jnp.zeros((out_feats,), jnp.float32)              # nn.init.zeros_

    # Node features per type.
    features = {
        n: jax.random.normal(k_feat[i], (n_nodes[n], in_feats), jnp.float32)
        for i, n in enumerate(NTYPES)
    }

    # Random 0/1 adjacency per relation: adj[dst, src] = 1 if edge src->dst.
    adjs = {}
    for i, (src, _, dst) in enumerate(CANONICAL_RELS):
        adjs[i] = jax.random.bernoulli(
            k_adj[i], 0.3, (n_nodes[dst], n_nodes[src])).astype(jnp.float32)

    out = rel_graph_conv_layer(features, adjs, weights, bias)
    out = jax.tree_util.tree_map(jax.block_until_ready, out)

    ref = rel_graph_conv_layer_ref(features, adjs, weights, bias)
    for n in NTYPES:
        assert out[n].shape == (n_nodes[n], out_feats)
        # bf16 MXU inputs with f32 accumulation -> bf16-level tolerance.
        assert jnp.allclose(out[n], ref[n], atol=5e-2, rtol=5e-2), n

    print("KERNEL_OK")
</pallas_src>

<mosaic_0001>
module attributes {stable_mosaic.version = 11 : i64} {
  func.func @_xw_kernel(%arg0: i32, %arg1: memref<7xi32, #tpu.memory_space<smem>>, %arg2: memref<24x128xbf16, #tpu.memory_space<vmem>>, %arg3: memref<128x128xbf16, #tpu.memory_space<vmem>>, %arg4: memref<24x128xbf16, #tpu.memory_space<vmem>>) attributes {dimension_semantics = [#tpu.dimension_semantics<parallel>], iteration_bounds = array<i64: 7>, scalar_prefetch = 1 : i64, scratch_operands = 0 : i64, tpu.core_type = #tpu.core_type<tc>, window_params = [{transform_indices = @transform_0, window_bounds = array<i64: 24, 128>}, {transform_indices = @transform_1, window_bounds = array<i64: 128, 128>}, {transform_indices = @transform_2, window_bounds = array<i64: 24, 128>}]} {
    %c0 = arith.constant 0 : index
    %c0_0 = arith.constant 0 : index
    %0 = vector.load %arg2[%c0, %c0_0] : memref<24x128xbf16, #tpu.memory_space<vmem>>, vector<24x128xbf16>
    %c0_1 = arith.constant 0 : index
    %c0_2 = arith.constant 0 : index
    %1 = vector.load %arg3[%c0_1, %c0_2] : memref<128x128xbf16, #tpu.memory_space<vmem>>, vector<128x128xbf16>
    %cst = arith.constant dense<0.000000e+00> : vector<24x128xf32>
    %2 = tpu.matmul %0, %1, %cst {dimension_numbers = #tpu.dot_dimension_numbers<[1], [0], [0], [1], [0, 0, 1, 1], [], []>} : vector<24x128xbf16>, vector<128x128xbf16>, vector<24x128xf32> -> vector<24x128xf32>
    %3 = arith.truncf %2 : vector<24x128xf32> to vector<24x128xbf16>
    %c0_3 = arith.constant 0 : index
    %c0_4 = arith.constant 0 : index
    %4 = vector.load %arg4[%c0_3, %c0_4] : memref<24x128xbf16, #tpu.memory_space<vmem>>, vector<24x128xbf16>
    tpu.vector_store %arg4[%c0_3, %c0_4], %3 {strides = array<i32>} : memref<24x128xbf16, #tpu.memory_space<vmem>>, vector<24x128xbf16>,
    return
  }
  func.func @transform_0(%arg0: i32, %arg1: memref<7xi32, #tpu.memory_space<smem>>) -> (i32, i32) {
    %0 = arith.index_cast %arg0 : i32 to index
    %1 = memref.load %arg1[%0] : memref<7xi32, #tpu.memory_space<smem>>
    %c0_i32 = arith.constant 0 : i32
    %c0_i32_0 = arith.constant 0 : i32
    return %1, %c0_i32 : i32, i32
  }
  func.func @transform_1(%arg0: i32, %arg1: memref<7xi32, #tpu.memory_space<smem>>) -> (i32, i32) {
    %c0_i32 = arith.constant 0 : i32
    %c0_i32_0 = arith.constant 0 : i32
    return %arg0, %c0_i32 : i32, i32
  }
  func.func @transform_2(%arg0: i32, %arg1: memref<7xi32, #tpu.memory_space<smem>>) -> (i32, i32) {
    %c0_i32 = arith.constant 0 : i32
    %c0_i32_0 = arith.constant 0 : i32
    return %arg0, %c0_i32 : i32, i32
  }
}

</mosaic_0001>

<bundles_post_ra>
// kernel: tpu_custom_call.1
= control target key start
LH: loop header
LB: loop body
LE: loop exit
PB: predicated region body
PF: predicated region fallthrough
CT: control target
= control target key end

     0   :  { %s789_s12 = smov [#allocation3]   ;;  %s1090_s0 = inlined_call_operand.hbm [shape: s32[7], index: 0, kind: input, shape index: {}]   ;;  %s1091_s1 = inlined_call_operand.hbm [shape: bf16[96,128], index: 1, kind: input, shape index: {}]   ;;  %s1092_s2 = inlined_call_operand.hbm [shape: bf16[896,128], index: 2, kind: input, shape index: {}]   ;;  %s1093_s3 = inlined_call_operand.hbm [shape: bf16[168,128], index: 3, kind: output, shape index: {}]  }
   0x1   :  { %9 = dma.hbm_to_smem %s1090_s0, 16, %s789_s12, [#allocation2] }
   0x2   :  { %747 = dma.done.wait [#allocation2], 16 }
   0x3   :  { %748 = vsyncadd [#allocation2], 4294967280 }
   0x4   :  { %11 = sfence }
   0x5   :  { %12 = vsyncpa [#allocation5], 0 }
   0x6   :  { %14 = vsyncpa [#allocation5 + $0x1], 0 }
   0x7   :  { %15 = vsyncpa [#allocation8], 0 }
   0x8   :  { %17 = vsyncpa [#allocation8 + $0x1], 0 }
   0x9   :  { %18 = vsyncpa [#allocation6], 0 }
   0xa   :  { %20 = vsyncpa [#allocation6 + $0x1], 0  ;;  %s820_s15 = smov 0   ;;  %s822_s16 = smov 0  }
   0xb   :  { %s824_s17 = smov 0   ;;  %s826_s18 = smov 0  }
   0xc   :  { %s828_s19 = smov 0   ;;  %s830_s0 = smov 0  }
   0xd   :  { %s832_s20 = smov 0  }
   0xe LB: > { %s854_s21 = sadd.s32 4294967295, %s787_s20   ;;  %s857_s22 = sadd.s32 1, %s787_s20   ;;  %s787_s20 = sphi %s832_s20, %s1128_s20   ;;  %s783_s0 = sphi %s830_s0, %s1127_s0   ;;  %s779_s19 = sphi %s828_s19, %s1126_s19   ;;  %s775_s18 = sphi %s826_s18, %s1125_s18   ;;  %s771_s17 = sphi %s824_s17, %s1124_s17   ;;  %s767_s16 = sphi %s822_s16, %s1123_s16   ;;  %s763_s15 = sphi %s820_s15, %s1122_s15  }
   0xf   : > { %s30_s23 = sld [smem:[#allocation3 + %s787_s20]]  ;;  %s35_s24 = sadd.s32 1, %s783_s0 }
  0x10   : > { %s31_s25 = sld [smem:[#allocation3 + %s857_s22]]  ;;  %p42_p0 = scmp.ne.s32.totalorder %s783_s0, %s779_s19 }
  0x11   : > { %p1096_p1 = scmp.eq.s32.totalorder %s787_s20, 0  ;;  %p48_p2 = scmp.ne.s32.totalorder %s779_s19, %s775_s18 }
  0x12   : > { %p1095_p3 = scmp.eq.s32.totalorder %s854_s21, 0  ;;  %p1094_p5 = scmp.lt.s32.totalorder %s787_s20, 7 }
  0x13   : > { %p44_p4 = por %p1096_p1, %p42_p0  ;;  %s124_s27 = sand.u32 1, %s783_s0  }
  0x14   : > { %p872_p6 = por %p1095_p3, %p48_p2  ;;  %s532_s28 = smul.u32 12, %s124_s27 }
  0x15   : > { %p879_p7 = pnand %p1094_p5, %p44_p4  ;;  %p473_p9 = scmp.ge.s32.totalorder %s787_s20, 1 }
  0x16   : > { %s1102_s26 = scalar_select %p872_p6, 1, 0 }
  0x17   : > { %s32_s29 = ssub.s32 %s30_s23, %s31_s25  ;;  %s128_s7 = scalar_lea.vmem [#allocation4], %s532_s28 }
  0x18   : > { %p33_p8 = scmp.eq.s32.totalorder %s32_s29, 0  ;;  %s136_s8 = sshll.u32 %s128_s7, 4  ;;  %s891_s8 = int_to_ptr.vmem [resolvable:$true] %s136_s8 }
  0x19   : > { %s535_s4 = scalar_select %p44_p4, [#allocation3], [#allocation10] }
  0x1a   : > { %s884_s5 = scalar_select %p33_p8, %s783_s0, %s35_s24  }
  0x1b   : > { %s536_s6 = scalar_select %p44_p4, %s787_s20, 0 }
  0x1c   : > { %s1130_s4 = smov (!%p1094_p5, %s535_s4), [#allocation11]  ;;  %p165_p10 = scmp.lt.s32.totalorder %s787_s20, 8 }
  0x1d   : > { %s1132_s6 = smov (!%p1094_p5, %s536_s6), 0  ;;  %s466_s12 = sadd.s32 4294967294, %s787_s20  }
  0x1e   : > { %s129_s9 = sld [smem:[%s1130_s4 + %s1132_s6]]  ;;  %p895_p11 = pnand %p473_p9, %p165_p10 }
  0x1f   : > { %s58_s13 = ssub.s32 %s787_s20, %s857_s22  ;;  %s911_s25 = scalar_lea.sflag [#allocation5], %s124_s27 }
  0x20   : > { %s1104_s10 = scalar_select %p895_p11, 1, 0 }
  0x21   : > { %p907_p12 = scmp.eq.s32.totalorder %s58_s13, 0  ;;  %p639_p0 = pneg %p879_p7 }
  0x22   : > { %s642_s6 = scalar_lea.hbm %s1091_s1, 768 }
  0x23   : > { %s1105_s24 = scalar_select %p907_p12, 1, 0 }
  0x24   : > { %s491_s11 = smul.u32 192, %s129_s9 }
  0x26   : > { %s905_s23 = scalar_lea.hbm %s1091_s1, %s491_s11 }
  0x27   : > { %s637_s28 = scalar_lea.hbm %s905_s23, 192  ;;  %p643_p8 = scmp.lt.s32.totalorder %s905_s23, %s1091_s1 }
  0x28   : > { %p638_p13 = scmp.ne.s32.totalorder %s905_s23, %s637_s28  ;;  %p644_p9 = scmp.lt.s32.totalorder %s642_s6, %s637_s28 }
  0x2a   : > { %p640_p2 = pnand %p639_p0, %p638_p13  ;;  %p645_p10 = por %p644_p9, %p643_p8 }
  0x2c   : > { %p641_p4 = pneg %p640_p2 }
  0x2e   : > { %p646_p5 = pnand %p645_p10, %p641_p4 }
  0x30   : > { %649 = shalt.err (!%p646_p5)
}
  0x31   : > { %s650_s27 = scalar_lea.vmem %s891_s8, 192  ;;  %s790_s11 = smov [#allocation4]  }
  0x32   : > { %p651_p3 = scmp.ne.s32.totalorder %s891_s8, %s650_s27  ;;  %s655_s13 = sshll.u32 %s790_s11, 4  ;;  %s656_s13 = int_to_ptr.vmem [resolvable:$false] %s655_s13 }
  0x33   : > { %s657_s14 = scalar_lea.vmem %s656_s13, 384  ;;  %p658_p2 = scmp.lt.s32.totalorder %s891_s8, %s656_s13 }
  0x34   : > { %p653_p1 = pnand %p651_p3, %p639_p0  ;;  %p659_p6 = scmp.lt.s32.totalorder %s657_s14, %s650_s27 }
  0x36   : > { %p654_p13 = pneg %p653_p1  ;;  %p660_p11 = por %p659_p6, %p658_p2 }
  0x38   : > { %p661_p12 = pnand %p660_p11, %p654_p13 }
  0x3a   : > { %664 = shalt.err (!%p661_p12)
}
  0x3b   : > { %s1098_s18 = smov 64   ;;  %s1099_s28 = smov 4  }
  0x3c   : > { %548 = dma.hbm_to_vmem [thread:$0]  (!%p879_p7), %s905_s23, 192, %s891_s8, %s911_s25, %s1098_s18, %s1098_s18, %s1099_s28  }
  0x3d   : > { %s61_s29 = sadd.s32 1, %s771_s17  ;;  %p68_p1 = scmp.ne.s32.totalorder %s771_s17, %s767_s16 }
  0x3e   : > { %p1106_p3 = scmp.ne.s32.totalorder %s1105_s24, 0  ;;  %p1107_p5 = scmp.eq.s32.totalorder %s787_s20, 0 }
  0x3f   : > { %p74_p11 = scmp.ne.s32.totalorder %s767_s16, %s763_s15  ;;  %p98_p12 = scmp.eq.s32.totalorder %s854_s21, 6 }
  0x40   : > { %s941_s4 = scalar_select %p1106_p3, %s771_s17, %s61_s29  }
  0x41   : > { %p945_p6 = por %p68_p1, %p1107_p5  ;;  %p104_p0 = scmp.eq.s32.totalorder %s466_s12, 6 }
  0x42   : > { %p1109_p4 = scmp.eq.s32.totalorder %s854_s21, 0  ;;  %s146_s8 = sand.u32 1, %s771_s17  }
  0x43   : > { %p961_p7 = por %p98_p12, %p68_p1  ;;  %p965_p9 = por %p104_p0, %p74_p11 }
  0x44   : > { %p956_p8 = por %p74_p11, %p1109_p4  ;;  %s470_s25 = sshll.u32 %s146_s8, 6 }
  0x45   : > { %s1111_s23 = scalar_select %p961_p7, 1, 0 }
  0x46   : > { %s1110_s30 = scalar_select %p956_p8, 1, 0 }
  0x47   : > { %s1112_s24 = scalar_select %p965_p9, 1, 0 }
  0x48   : > { %s492_s7 = sshll.u32 %s787_s20, 10  ;;  %s150_s11 = scalar_lea.vmem [#allocation7], %s470_s25 }
  0x49   : > { %s973_s12 = scalar_lea.hbm %s1092_s2, %s492_s7  ;;  %s157_s13 = sshll.u32 %s150_s11, 4  ;;  %s975_s13 = int_to_ptr.vmem [resolvable:$true] %s157_s13 }
  0x4a   : > { %p1113_p10 = scmp.lt.s32.totalorder %s787_s20, 7  ;;  %s985_s29 = scalar_lea.sflag [#allocation8], %s146_s8 }
  0x4b   : > { %s665_s18 = scalar_lea.hbm %s973_s12, 1024  ;;  %s670_s9 = scalar_lea.hbm %s1092_s2, 7168 }
  0x4c   : > { %p981_p13 = pnand %p1113_p10, %p945_p6  ;;  %p666_p2 = scmp.ne.s32.totalorder %s973_s12, %s665_s18 }
  0x4d   : > { %p671_p6 = scmp.lt.s32.totalorder %s973_s12, %s1092_s2  ;;  %p672_p11 = scmp.lt.s32.totalorder %s670_s9, %s665_s18 }
  0x4e   : > { %p667_p1 = pneg %p981_p13 }
  0x4f   : > { %p673_p12 = por %p672_p11, %p671_p6 }
  0x50   : > { %p668_p3 = pnand %p667_p1, %p666_p2 }
  0x52   : > { %p669_p5 = pneg %p668_p3 }
  0x54   : > { %p674_p0 = pnand %p673_p12, %p669_p5 }
  0x56   : > { %677 = shalt.err (!%p674_p0)
}
  0x57   : > { %s678_s8 = scalar_lea.vmem %s975_s13, 1024  ;;  %s793_s11 = smov [#allocation7]  }
  0x58   : > { %p679_p4 = scmp.ne.s32.totalorder %s975_s13, %s678_s8  ;;  %s683_s28 = sshll.u32 %s793_s11, 4  ;;  %s684_s28 = int_to_ptr.vmem [resolvable:$false] %s683_s28 }
  0x59   : > { %s685_s7 = scalar_lea.vmem %s684_s28, 2048  ;;  %p686_p3 = scmp.lt.s32.totalorder %s975_s13, %s684_s28 }
  0x5a   : > { %p681_p10 = pnand %p679_p4, %p667_p1  ;;  %p687_p9 = scmp.lt.s32.totalorder %s685_s7, %s678_s8 }
  0x5c   : > { %p682_p2 = pneg %p681_p10  ;;  %p688_p7 = por %p687_p9, %p686_p3 }
  0x5e   : > { %p689_p8 = pnand %p688_p7, %p682_p2 }
  0x60   : > { %692 = shalt.err (!%p689_p8)
}
  0x61   : > { %s1115_s18 = smov 4   ;;  %s1116_s25 = smov 64  }
  0x62   : > { %551 = dma.hbm_to_vmem [thread:$0]  (!%p981_p13), %s973_s12, 1024, %s975_s13, %s985_s29, %s1116_s25, %s1116_s25, %s1115_s18  }
  0x63   : > { %p1117_p1 = scmp.ne.s32.totalorder %s1104_s10, 0 }
  0x64   : > { %s171_s9 = sand.u32 (!%p1117_p1), 1, %s779_s19   ;;  %p1118_p8 = scmp.ne.s32.totalorder (!%p1117_p1), %s1102_s26, 0 }
  0x65   : > { %169 = sbr.rel (%p1117_p1) target bundleno = 359 (0x167), region = 28  ;;  %s172_s27 = scalar_lea.sflag (!%p1117_p1), [#allocation5], %s171_s9 }
  0x66   : > { %s1012_s28 = smul.u32 (!%p1117_p1), 12, %s171_s9 }
  0x68   : > { %s175_s6 = scalar_lea.vmem (!%p1117_p1), [#allocation4], %s1012_s28 }
  0x6a   : > { %750 = dma.done.wait (%p1118_p8), %s172_s27, 192  }
  0x6b   : > { %752 = vsyncadd (%p1118_p8), %s172_s27, 4294967104  ;;  %s1020_s14 = sand.u32 1, %s767_s16   ;;  %p1119_p7 = scmp.ne.s32.totalorder %s1110_s30, 0 }
  0x6c   : > { %s474_s10 = sshll.u32 %s1020_s14, 6  ;;  %s181_s12 = scalar_lea.sflag [#allocation8], %s1020_s14 }
  0x6d   : > { %s184_s13 = scalar_lea.vmem [#allocation7], %s474_s10 }
  0x6e   : > { %754 = dma.done.wait (%p1119_p7), %s181_s12, 1024  }
  0x6f   : > { %756 = vsyncadd (%p1119_p7), %s181_s12, 4294966272  ;;  %v619_v0 = vld [vmem:[%s184_s13 + $0x38] sm:$0xff]   ;;  %v620_v1 = vld [vmem:[%s184_s13 + $0x30] sm:$0xff]   ;;  %s534_s26 = smul.u32 12, %s1020_s14  ;;  %s357_s25 = scalar_lea.sflag [#allocation6], %s1020_s14 }
  0x70   : > { %512 = vmatprep.subr.bf16.mxu0 %v619_v0  ;;  %v621_v2 = vld [vmem:[%s184_s13 + $0x28] sm:$0xff]   ;;  %v622_v3 = vld [vmem:[%s184_s13 + $0x20] sm:$0xff]   ;;  %v623_v5 = vld [vmem:[%s184_s13 + $0x18] sm:$0xff]   ;;  %s496_s8 = smul.u32 192, %s854_s21  ;;  %p1120_p13 = scmp.ne.s32.totalorder %s1111_s23, 0 }
  0x71   : > { %513 = vmatpush3.bf16.msra.mxu0 %v619_v0  ;;  %v627_v4 = vld [vmem:[%s175_s6] sm:$0xff]   ;;  %v626_v8 = vld [vmem:[%s184_s13] sm:$0xff]   ;;  %v628_v9 = vld [vmem:[%s175_s6 + $0x8] ss:$0 sps:$4 sm:$0xff]   ;;  %s209_s30 = scalar_lea.vmem [#allocation9], %s534_s26  ;;  %s794_s21 = smov [#allocation9]  }
  0x72   : > { %514 = vmatprep.subr.bf16.mxu0 %v620_v1  ;;  %528 = vmatprep.mubr.bf16.mxu0 %v627_v4  ;;  %v624_v6 = vld [vmem:[%s184_s13 + $0x10] sm:$0xff]   ;;  %v625_v7 = vld [vmem:[%s184_s13 + $0x8] sm:$0xff]   ;;  %s370_s29 = sshll.u32 %s209_s30, 4  ;;  %s1039_s18 = scalar_lea.hbm %s1093_s3, %s496_s8  ;;  %s1034_s29 = int_to_ptr.vmem [resolvable:$true] %s370_s29 }
  0x73   : > { %s693_s9 = scalar_lea.vmem %s1034_s29, 192  ;;  %s697_s28 = sshll.u32 %s794_s21, 4  ;;  %s698_s28 = int_to_ptr.vmem [resolvable:$false] %s697_s28 }
  0x74   : > { %p694_p9 = scmp.ne.s32.totalorder %s1034_s29, %s693_s9  ;;  %s699_s27 = scalar_lea.vmem %s698_s28, 384 }
  0x75   : > { %515 = vmatpush3.bf16.msra.mxu0 %v620_v1  ;;  %p700_p11 = scmp.lt.s32.totalorder %s1034_s29, %s698_s28  ;;  %p701_p12 = scmp.lt.s32.totalorder %s699_s27, %s693_s9 }
  0x76   : > { %516 = vmatprep.subr.bf16.mxu0 %v621_v2  ;;  %p695_p5 = pnand %p694_p9, %p1120_p13 }
  0x77   : > { %p702_p0 = por %p701_p12, %p700_p11 }
  0x78   : > { %p696_p6 = pneg %p695_p5 }
  0x79   : > { %517 = vmatpush3.bf16.msra.mxu0 %v621_v2 }
  0x7a   : > { %518 = vmatprep.subr.bf16.mxu0 %v622_v3  ;;  %p703_p4 = pnand %p702_p0, %p696_p6 }
  0x7d   : > { %519 = vmatpush3.bf16.msra.mxu0 %v622_v3 }
  0x7e   : > { %520 = vmatprep.subr.bf16.mxu0 %v623_v5 }
  0x81   : > { %521 = vmatpush3.bf16.msra.mxu0 %v623_v5 }
  0x82   : > { %522 = vmatprep.subr.bf16.mxu0 %v624_v6 }
  0x85   : > { %523 = vmatpush3.bf16.msra.mxu0 %v624_v6 }
  0x86   : > { %524 = vmatprep.subr.bf16.mxu0 %v625_v7 }
  0x89   : > { %525 = vmatpush3.bf16.msra.mxu0 %v625_v7 }
  0x8a   : > { %526 = vmatprep.subr.bf16.mxu0 %v626_v8 }
  0x8d   : > { %527 = vmatpush3.bf16.msra.mxu0 %v626_v8 }
  0x90   : > { %529 = vmatmul.mubr.bf16.vlgmr.msra.gmra.mxu0 %v628_v9 }
 0x150   : > { %v530_v10 = vpop.f32.mrf.mxu0 }
 0x151   : > { %v495_v11 = vpack.c.bf16 %v530_v10, %v530_v10 }
 0x152   : > { %v326_v12 = vpop.f32.mrf.mxu0 }
 0x153   : > { %355 = vst [vmem:[%s209_s30 + $0x8] sm:$0xf] %v495_v11 }
 0x154   : > { %v531_v13 = vpop.f32.mrf.mxu0 }
 0x156   : > { %v329_v14 = vpop.f32.mrf.mxu0 }
 0x157   : > { %v500_v15 = vpack.c.bf16 %v329_v14, %v326_v12 }
 0x159   : > { %501 = vst [vmem:[%s209_s30] sm:$0xff] %v500_v15  }
 0x15a   : > { %706 = shalt.err (!%p703_p4)
}
 0x15b   : > { %s707_s6 = scalar_lea.hbm %s1039_s18, 192  ;;  %s711_s13 = scalar_lea.hbm %s1093_s3, 1344 }
 0x15c   : > { %p708_p10 = scmp.ne.s32.totalorder %s1039_s18, %s707_s6  ;;  %p712_p1 = scmp.lt.s32.totalorder %s1039_s18, %s1093_s3 }
 0x15d   : > { %p713_p8 = scmp.lt.s32.totalorder %s711_s13, %s707_s6 }
 0x15e   : > { %p709_p2 = pnand %p708_p10, %p1120_p13 }
 0x15f   : > { %p714_p7 = por %p713_p8, %p712_p1 }
 0x160   : > { %p710_p3 = pneg %p709_p2 }
 0x162   : > { %p715_p9 = pnand %p714_p7, %p710_p3 }
 0x164   : > { %718 = shalt.err (!%p715_p9)
}
 0x165   : > { %s795_s8 = smov 64   ;;  %s796_s11 = smov 4  }
 0x166   : > { %541 = dma.vmem_to_hbm [thread:$0]  (%p1120_p13), %s1034_s29, 192, %s1039_s18, %s357_s25, %s795_s8, %s795_s8, %s796_s11  }
 0x167 PF: > { %p557_p5 = scmp.ge.s32.totalorder %s787_s20, 2  ;;  %s385_s7 = sand.u32 1, %s763_s15  }
 0x168   : > { %p1121_p6 = scmp.ne.s32.totalorder %s1112_s24, 0  ;;  %s386_s9 = scalar_lea.sflag [#allocation6], %s385_s7 }
 0x16a   : > { %p553_p11 = pnand %p557_p5, %p1121_p6 }
 0x16c   : > { %p554_p12 = pneg %p553_p11 }
 0x16e   : > { %758 = dma.done.wait (%p554_p12), %s386_s9, 192  }
 0x16f   : > { %760 = vsyncadd (%p554_p12), %s386_s9, 4294967104  ;;  %p23_p13 = scmp.ge.s32.totalorder %s857_s22, 9   ;;  %s1122_s15 = smov %s767_s16 }
 0x170   : > { %s1123_s16 = smov %s771_s17  ;;  %s1124_s17 = smov %s941_s4 }
 0x171   : > { %s1125_s18 = smov %s779_s19  ;;  %s1126_s19 = smov %s783_s0 }
 0x172   : > { %s1127_s0 = smov %s884_s5  ;;  %s1128_s20 = smov %s857_s22 }
 0x173   :  { %25 = sbr.rel (!%p23_p13) target bundleno = 14 (0xe), region = 86 }
 0x178   :  { %391 = vsyncpa [#allocation5], 1 }
 0x179   :  { %393 = vsyncpa [#allocation5 + $0x1], 1 }
 0x17a   :  { %394 = vsyncpa [#allocation8], 1 }
 0x17b   :  { %396 = vsyncpa [#allocation8 + $0x1], 1 }
 0x17c   :  { %397 = vsyncpa [#allocation6], 1 }
 0x17d   :  { %399 = vsyncpa [#allocation6 + $0x1], 1 }

</bundles_post_ra>
